<compile_context>
chip_gen: v7x
topology: tpu7x:2x2x1
jax: 0.10.0
libtpu: 0.0.40
codegen_flags: <defaults>
</compile_context>

<pallas_src>
import functools

import jax
import jax.numpy as jnp
from jax.experimental import pallas as pl
from jax.experimental.pallas import tpu as pltpu


def _lstm_recurrence_kernel(xg_ref, whh_t_ref,      # inputs
                            out_ref, cn_ref,        # outputs
                            h_sc, c_sc,             # scratch
                            *, chunk, hidden):
    """One grid step == one (batch_tile, time_chunk) pair of the recurrence.

    xg_ref   : (chunk, Bt, 4H) f32  precomputed x@W_ih^T + b, gate-permuted (i,f,o,g)
    whh_t_ref: (H, 4H)         f32  W_hh^T, gate-permuted (grid-invariant)
    out_ref  : (chunk, Bt, H)  f32  h_t, time-major slab (tile-aligned per-step store)
    cn_ref   : (Bt, H)         f32  final cell state (written on last time chunk)
    h_sc/c_sc: (Bt, H)         f32  recurrent state carried across time chunks
    """
    n = pl.program_id(1)          # time-chunk axis (inner, "arbitrary")
    H = hidden

    @pl.when(n == 0)
    def _():
        h_sc[...] = jnp.zeros_like(h_sc)
        c_sc[...] = jnp.zeros_like(c_sc)

    whh_t = whh_t_ref[...]        # (H, 4H) f32, resident across the chunk
    h = h_sc[...]                 # (Bt, H) f32
    c = c_sc[...]                 # (Bt, H) f32

    def step(t, h, c):
        # Tile-aligned per-step gate load + f32 MXU recurrent matmul.
        gates = xg_ref[t] + jnp.dot(h, whh_t, preferred_element_type=jnp.float32)
        # Gate-permuted layout (i, f, o, g): one sigmoid over 3H, one tanh over H.
        sig = jax.nn.sigmoid(gates[:, :3 * H])
        i_g = sig[:, 0 * H:1 * H]
        f_g = sig[:, 1 * H:2 * H]
        o_g = sig[:, 2 * H:3 * H]
        g_g = jnp.tanh(gates[:, 3 * H:])
        c = f_g * c + i_g * g_g
        h = o_g * jnp.tanh(c)
        out_ref[t] = h.astype(out_ref.dtype)   # aligned (Bt, H) store, lane offset 0
        return h, c

    if chunk <= 16:
        # Small chunk: full static unroll (maximum LLO visibility, no vreg pressure).
        for t in range(chunk):
            h, c = step(t, h, c)
    else:
        # Long chunk: bounded unroll keeps instruction memory / vreg pressure sane.
        def body(t, carry):
            return step(t, *carry)
        h, c = jax.lax.fori_loop(0, chunk, body, (h, c), unroll=8)

    h_sc[...] = h
    c_sc[...] = c

    @pl.when(n == pl.num_programs(1) - 1)
    def _():
        cn_ref[...] = c.astype(cn_ref.dtype)


def lstm_forward(x_btI, w_ih, w_hh, b_ih, b_hh, *, time_chunk=None, batch_tile=None):
    """x_btI: (B, T, I).  Weights in PyTorch layout:
       w_ih: (4H, I), w_hh: (4H, H), b_ih/b_hh: (4H,).
       Returns (outputs (B,T,H), (h_n (1,B,H), c_n (1,B,H)))."""
    B, T, I = x_btI.shape
    fourH, H = w_hh.shape
    assert fourH == 4 * H

    # ---- gate-column permutation: PyTorch (i, f, g, o) -> (i, f, o, g) ----
    perm = jnp.concatenate([jnp.arange(0, H), jnp.arange(H, 2 * H),
                            jnp.arange(3 * H, 4 * H), jnp.arange(2 * H, 3 * H)])
    w_ih_p = w_ih[perm]                     # (4H, I)
    w_hh_p = w_hh[perm]                     # (4H, H)
    bias_p = (b_ih + b_hh)[perm]            # (4H,)

    # ---- batch padded to the f32 sublane quantum ----
    B_pad = max(8, ((B + 7) // 8) * 8)
    bt = B_pad if batch_tile is None else batch_tile
    assert bt % 8 == 0 and B_pad % bt == 0, "batch_tile must be a multiple of 8"
    n_btiles = B_pad // bt

    chunk = T if time_chunk is None else time_chunk
    assert T % chunk == 0, "time_chunk must divide T"
    n_chunks = T // chunk

    x_pad = x_btI if B_pad == B else jnp.pad(x_btI, ((0, B_pad - B), (0, 0), (0, 0)))

    # ---- time-parallel input projection hoisted to XLA (pipelined kernel input) ----
    # Laid out time-major (T, B_pad, 4H) so every per-step read in the kernel is a
    # tile-aligned (B_pad, 4H) load; overlaps the serial recurrence via BlockSpec DMA.
    xg = (jnp.einsum('bti,gi->tbg', x_pad.astype(jnp.float32),
                     w_ih_p.astype(jnp.float32),
                     precision=jax.lax.Precision.HIGHEST)
          + bias_p.astype(jnp.float32))                     # (T, B_pad, 4H) f32

    whh_t = jnp.transpose(w_hh_p).astype(jnp.float32)       # (H, 4H) f32

    kernel = functools.partial(_lstm_recurrence_kernel, chunk=chunk, hidden=H)

    out_tbh, c_last = pl.pallas_call(
        kernel,
        out_shape=(
            jax.ShapeDtypeStruct((T, B_pad, H), x_btI.dtype),   # outputs, time-major
            jax.ShapeDtypeStruct((B_pad, H), x_btI.dtype),      # c_n
        ),
        grid_spec=pltpu.PrefetchScalarGridSpec(
            num_scalar_prefetch=0,
            grid=(n_btiles, n_chunks),
            in_specs=[
                pl.BlockSpec((chunk, bt, fourH), lambda b, n: (n, b, 0)),  # gate slab
                # NOTE: grid-invariant weight; pl.Buffered(1) would halve its VMEM copy,
                # omitted here since the weight block is tiny at these shapes.
                pl.BlockSpec((H, fourH), lambda b, n: (0, 0)),             # W_hh^T
            ],
            out_specs=[
                pl.BlockSpec((chunk, bt, H), lambda b, n: (n, b, 0)),      # h slab
                pl.BlockSpec((bt, H), lambda b, n: (b, 0)),                # c_n (resident)
            ],
            scratch_shapes=[
                pltpu.VMEM((bt, H), jnp.float32),   # h carry
                pltpu.VMEM((bt, H), jnp.float32),   # c carry
            ],
        ),
        compiler_params=pltpu.CompilerParams(
            dimension_semantics=("parallel", "arbitrary"),  # batch parallel, time serial
        ),
    )(xg, whh_t)

    outputs = jnp.transpose(out_tbh[:, :B, :], (1, 0, 2))   # (B, T, H)
    h_n = outputs[:, -1, :][jnp.newaxis]                    # h_n == last output
    c_n = c_last[:B][jnp.newaxis]
    return outputs, (h_n, c_n)


def lstm_reference(x, w_ih, w_hh, b_ih, b_hh):
    """Pure-JAX f32 reference mirroring PyTorch nn.LSTM (1 layer, unidir)."""
    B, T, I = x.shape
    H = w_hh.shape[1]
    h = jnp.zeros((B, H), jnp.float32)
    c = jnp.zeros((B, H), jnp.float32)
    outs = []
    for t in range(T):
        g = x[:, t, :] @ w_ih.T + b_ih + h @ w_hh.T + b_hh
        i = jax.nn.sigmoid(g[:, 0 * H:1 * H])
        f = jax.nn.sigmoid(g[:, 1 * H:2 * H])
        gg = jnp.tanh(g[:, 2 * H:3 * H])
        o = jax.nn.sigmoid(g[:, 3 * H:4 * H])
        c = f * c + i * gg
        h = o * jnp.tanh(c)
        outs.append(h)
    return jnp.stack(outs, axis=1), (h[None], c[None])


if __name__ == "__main__":
    # Shapes implied by the module: RNN(input_size=16, hid_size=32), seq=8, batch=2.
    B, T, INPUT_SIZE, HID_SIZE = 2, 8, 16, 32

    key = jax.random.PRNGKey(0)
    kx, k1, k2, k3, k4 = jax.random.split(key, 5)
    bound = 1.0 / (HID_SIZE ** 0.5)   # PyTorch LSTM default init range

    x = jax.random.normal(kx, (B, T, INPUT_SIZE), dtype=jnp.float32)
    w_ih = jax.random.uniform(k1, (4 * HID_SIZE, INPUT_SIZE), jnp.float32, -bound, bound)
    w_hh = jax.random.uniform(k2, (4 * HID_SIZE, HID_SIZE), jnp.float32, -bound, bound)
    b_ih = jax.random.uniform(k3, (4 * HID_SIZE,), jnp.float32, -bound, bound)
    b_hh = jax.random.uniform(k4, (4 * HID_SIZE,), jnp.float32, -bound, bound)

    outputs, (h_n, c_n) = lstm_forward(x, w_ih, w_hh, b_ih, b_hh)
    jax.block_until_ready((outputs, h_n, c_n))

    # Correctness check against the pure-JAX f32 reference of PyTorch semantics.
    ref_out, (ref_h, ref_c) = lstm_reference(x, w_ih, w_hh, b_ih, b_hh)
    assert outputs.shape == (B, T, HID_SIZE)
    assert h_n.shape == (1, B, HID_SIZE) and c_n.shape == (1, B, HID_SIZE)
    assert jnp.allclose(outputs, ref_out, atol=1e-2, rtol=1e-2), "outputs mismatch"
    assert jnp.allclose(h_n, ref_h, atol=1e-2, rtol=1e-2), "h_n mismatch"
    assert jnp.allclose(c_n, ref_c, atol=1e-2, rtol=1e-2), "c_n mismatch"

    print("KERNEL_OK")
</pallas_src>

<mosaic_0001>
module attributes {stable_mosaic.version = 11 : i64} {
  func.func @_lstm_recurrence_kernel(%arg0: i32, %arg1: i32, %arg2: memref<8x8x128xf32, #tpu.memory_space<vmem>>, %arg3: memref<32x128xf32, #tpu.memory_space<vmem>>, %arg4: memref<8x8x32xf32, #tpu.memory_space<vmem>>, %arg5: memref<8x32xf32, #tpu.memory_space<vmem>>, %arg6: memref<8x32xf32, #tpu.memory_space<vmem>>, %arg7: memref<8x32xf32, #tpu.memory_space<vmem>>) attributes {dimension_semantics = [#tpu.dimension_semantics<parallel>, #tpu.dimension_semantics<arbitrary>], iteration_bounds = array<i64: 1, 1>, scalar_prefetch = 0 : i64, scratch_operands = 2 : i64, tpu.core_type = #tpu.core_type<tc>, window_params = [{transform_indices = @transform_0, window_bounds = array<i64: 8, 8, 128>}, {pipeline_mode = #tpu.pipeline_mode<synchronous>, transform_indices = @transform_1, window_bounds = array<i64: 32, 128>}, {transform_indices = @transform_2, window_bounds = array<i64: 8, 8, 32>}, {transform_indices = @transform_3, window_bounds = array<i64: 8, 32>}]} {
    %c0_i32 = arith.constant 0 : i32
    %0 = arith.cmpi eq, %arg1, %c0_i32 : i32
    %1 = arith.extui %0 : i1 to i32
    %c0_i32_0 = arith.constant 0 : i32
    %2 = arith.cmpi ne, %1, %c0_i32_0 : i32
    scf.if %2 {
      %cst_68 = arith.constant 0.000000e+00 : f32
      %195 = vector.broadcast %cst_68 : f32 to vector<8x32xf32>
      %c0_69 = arith.constant 0 : index
      %c0_70 = arith.constant 0 : index
      %196 = vector.load %arg6[%c0_69, %c0_70] : memref<8x32xf32, #tpu.memory_space<vmem>>, vector<8x32xf32>
      tpu.vector_store %arg6[%c0_69, %c0_70], %195 {strides = array<i32>} : memref<8x32xf32, #tpu.memory_space<vmem>>, vector<8x32xf32>,
      %cst_71 = arith.constant 0.000000e+00 : f32
      %197 = vector.broadcast %cst_71 : f32 to vector<8x32xf32>
      %c0_72 = arith.constant 0 : index
      %c0_73 = arith.constant 0 : index
      %198 = vector.load %arg7[%c0_72, %c0_73] : memref<8x32xf32, #tpu.memory_space<vmem>>, vector<8x32xf32>
      tpu.vector_store %arg7[%c0_72, %c0_73], %197 {strides = array<i32>} : memref<8x32xf32, #tpu.memory_space<vmem>>, vector<8x32xf32>,
    } else {
    }
    %c0 = arith.constant 0 : index
    %c0_1 = arith.constant 0 : index
    %3 = vector.load %arg3[%c0, %c0_1] : memref<32x128xf32, #tpu.memory_space<vmem>>, vector<32x128xf32>
    %c0_2 = arith.constant 0 : index
    %c0_3 = arith.constant 0 : index
    %4 = vector.load %arg6[%c0_2, %c0_3] : memref<8x32xf32, #tpu.memory_space<vmem>>, vector<8x32xf32>
    %c0_4 = arith.constant 0 : index
    %c0_5 = arith.constant 0 : index
    %5 = vector.load %arg7[%c0_4, %c0_5] : memref<8x32xf32, #tpu.memory_space<vmem>>, vector<8x32xf32>
    %c0_6 = arith.constant 0 : index
    %c0_7 = arith.constant 0 : index
    %c0_8 = arith.constant 0 : index
    %6 = vector.load %arg2[%c0_6, %c0_7, %c0_8] : memref<8x8x128xf32, #tpu.memory_space<vmem>>, vector<1x8x128xf32>
    %7 = vector.shape_cast %6 : vector<1x8x128xf32> to vector<8x128xf32>
    %cst = arith.constant dense<0.000000e+00> : vector<8x128xf32>
    %8 = tpu.matmul %4, %3, %cst {dimension_numbers = #tpu.dot_dimension_numbers<[1], [0], [0], [1], [0, 0, 1, 1], [], []>} : vector<8x32xf32>, vector<32x128xf32>, vector<8x128xf32> -> vector<8x128xf32>
    %9 = arith.addf %7, %8 : vector<8x128xf32>
    %10 = vector.extract_strided_slice %9 {offsets = [0, 0], sizes = [8, 96], strides = [1, 1]} : vector<8x128xf32> to vector<8x96xf32>
    %11 = arith.negf %10 : vector<8x96xf32>
    %12 = math.exp %11 : vector<8x96xf32>
    %cst_9 = arith.constant 1.000000e+00 : f32
    %13 = vector.broadcast %cst_9 : f32 to vector<8x96xf32>
    %14 = arith.addf %13, %12 : vector<8x96xf32>
    %15 = arith.divf %13, %14 : vector<8x96xf32>
    %16 = vector.extract_strided_slice %15 {offsets = [0, 0], sizes = [8, 32], strides = [1, 1]} : vector<8x96xf32> to vector<8x32xf32>
    %17 = vector.extract_strided_slice %15 {offsets = [0, 32], sizes = [8, 32], strides = [1, 1]} : vector<8x96xf32> to vector<8x32xf32>
    %18 = vector.extract_strided_slice %15 {offsets = [0, 64], sizes = [8, 32], strides = [1, 1]} : vector<8x96xf32> to vector<8x32xf32>
    %19 = vector.extract_strided_slice %9 {offsets = [0, 96], sizes = [8, 32], strides = [1, 1]} : vector<8x128xf32> to vector<8x32xf32>
    %20 = math.tanh %19 : vector<8x32xf32>
    %21 = arith.mulf %17, %5 : vector<8x32xf32>
    %22 = arith.mulf %16, %20 : vector<8x32xf32>
    %23 = arith.addf %21, %22 : vector<8x32xf32>
    %24 = math.tanh %23 : vector<8x32xf32>
    %25 = arith.mulf %18, %24 : vector<8x32xf32>
    %c0_10 = arith.constant 0 : index
    %c0_11 = arith.constant 0 : index
    %c0_12 = arith.constant 0 : index
    %26 = vector.load %arg4[%c0_10, %c0_11, %c0_12] : memref<8x8x32xf32, #tpu.memory_space<vmem>>, vector<1x8x32xf32>
    %27 = vector.shape_cast %26 : vector<1x8x32xf32> to vector<8x32xf32>
    %28 = vector.shape_cast %25 : vector<8x32xf32> to vector<1x8x32xf32>
    tpu.vector_store %arg4[%c0_10, %c0_11, %c0_12], %28 {strides = array<i32>} : memref<8x8x32xf32, #tpu.memory_space<vmem>>, vector<1x8x32xf32>,
    %c1 = arith.constant 1 : index
    %c0_13 = arith.constant 0 : index
    %c0_14 = arith.constant 0 : index
    %29 = vector.load %arg2[%c1, %c0_13, %c0_14] : memref<8x8x128xf32, #tpu.memory_space<vmem>>, vector<1x8x128xf32>
    %30 = vector.shape_cast %29 : vector<1x8x128xf32> to vector<8x128xf32>
    %cst_15 = arith.constant dense<0.000000e+00> : vector<8x128xf32>
    %31 = tpu.matmul %25, %3, %cst_15 {dimension_numbers = #tpu.dot_dimension_numbers<[1], [0], [0], [1], [0, 0, 1, 1], [], []>} : vector<8x32xf32>, vector<32x128xf32>, vector<8x128xf32> -> vector<8x128xf32>
    %32 = arith.addf %30, %31 : vector<8x128xf32>
    %33 = vector.extract_strided_slice %32 {offsets = [0, 0], sizes = [8, 96], strides = [1, 1]} : vector<8x128xf32> to vector<8x96xf32>
    %34 = arith.negf %33 : vector<8x96xf32>
    %35 = math.exp %34 : vector<8x96xf32>
    %cst_16 = arith.constant 1.000000e+00 : f32
    %36 = vector.broadcast %cst_16 : f32 to vector<8x96xf32>
    %37 = arith.addf %36, %35 : vector<8x96xf32>
    %38 = arith.divf %36, %37 : vector<8x96xf32>
    %39 = vector.extract_strided_slice %38 {offsets = [0, 0], sizes = [8, 32], strides = [1, 1]} : vector<8x96xf32> to vector<8x32xf32>
    %40 = vector.extract_strided_slice %38 {offsets = [0, 32], sizes = [8, 32], strides = [1, 1]} : vector<8x96xf32> to vector<8x32xf32>
    %41 = vector.extract_strided_slice %38 {offsets = [0, 64], sizes = [8, 32], strides = [1, 1]} : vector<8x96xf32> to vector<8x32xf32>
    %42 = vector.extract_strided_slice %32 {offsets = [0, 96], sizes = [8, 32], strides = [1, 1]} : vector<8x128xf32> to vector<8x32xf32>
    %43 = math.tanh %42 : vector<8x32xf32>
    %44 = arith.mulf %40, %23 : vector<8x32xf32>
    %45 = arith.mulf %39, %43 : vector<8x32xf32>
    %46 = arith.addf %44, %45 : vector<8x32xf32>
    %47 = math.tanh %46 : vector<8x32xf32>
    %48 = arith.mulf %41, %47 : vector<8x32xf32>
    %c1_17 = arith.constant 1 : index
    %c0_18 = arith.constant 0 : index
    %c0_19 = arith.constant 0 : index
    %49 = vector.load %arg4[%c1_17, %c0_18, %c0_19] : memref<8x8x32xf32, #tpu.memory_space<vmem>>, vector<1x8x32xf32>
    %50 = vector.shape_cast %49 : vector<1x8x32xf32> to vector<8x32xf32>
    %51 = vector.shape_cast %48 : vector<8x32xf32> to vector<1x8x32xf32>
    tpu.vector_store %arg4[%c1_17, %c0_18, %c0_19], %51 {strides = array<i32>} : memref<8x8x32xf32, #tpu.memory_space<vmem>>, vector<1x8x32xf32>,
    %c2 = arith.constant 2 : index
    %c0_20 = arith.constant 0 : index
    %c0_21 = arith.constant 0 : index
    %52 = vector.load %arg2[%c2, %c0_20, %c0_21] : memref<8x8x128xf32, #tpu.memory_space<vmem>>, vector<1x8x128xf32>
    %53 = vector.shape_cast %52 : vector<1x8x128xf32> to vector<8x128xf32>
    %cst_22 = arith.constant dense<0.000000e+00> : vector<8x128xf32>
    %54 = tpu.matmul %48, %3, %cst_22 {dimension_numbers = #tpu.dot_dimension_numbers<[1], [0], [0], [1], [0, 0, 1, 1], [], []>} : vector<8x32xf32>, vector<32x128xf32>, vector<8x128xf32> -> vector<8x128xf32>
    %55 = arith.addf %53, %54 : vector<8x128xf32>
    %56 = vector.extract_strided_slice %55 {offsets = [0, 0], sizes = [8, 96], strides = [1, 1]} : vector<8x128xf32> to vector<8x96xf32>
    %57 = arith.negf %56 : vector<8x96xf32>
    %58 = math.exp %57 : vector<8x96xf32>
    %cst_23 = arith.constant 1.000000e+00 : f32
    %59 = vector.broadcast %cst_23 : f32 to vector<8x96xf32>
    %60 = arith.addf %59, %58 : vector<8x96xf32>
    %61 = arith.divf %59, %60 : vector<8x96xf32>
    %62 = vector.extract_strided_slice %61 {offsets = [0, 0], sizes = [8, 32], strides = [1, 1]} : vector<8x96xf32> to vector<8x32xf32>
    %63 = vector.extract_strided_slice %61 {offsets = [0, 32], sizes = [8, 32], strides = [1, 1]} : vector<8x96xf32> to vector<8x32xf32>
    %64 = vector.extract_strided_slice %61 {offsets = [0, 64], sizes = [8, 32], strides = [1, 1]} : vector<8x96xf32> to vector<8x32xf32>
    %65 = vector.extract_strided_slice %55 {offsets = [0, 96], sizes = [8, 32], strides = [1, 1]} : vector<8x128xf32> to vector<8x32xf32>
    %66 = math.tanh %65 : vector<8x32xf32>
    %67 = arith.mulf %63, %46 : vector<8x32xf32>
    %68 = arith.mulf %62, %66 : vector<8x32xf32>
    %69 = arith.addf %67, %68 : vector<8x32xf32>
    %70 = math.tanh %69 : vector<8x32xf32>
    %71 = arith.mulf %64, %70 : vector<8x32xf32>
    %c2_24 = arith.constant 2 : index
    %c0_25 = arith.constant 0 : index
    %c0_26 = arith.constant 0 : index
    %72 = vector.load %arg4[%c2_24, %c0_25, %c0_26] : memref<8x8x32xf32, #tpu.memory_space<vmem>>, vector<1x8x32xf32>
    %73 = vector.shape_cast %72 : vector<1x8x32xf32> to vector<8x32xf32>
    %74 = vector.shape_cast %71 : vector<8x32xf32> to vector<1x8x32xf32>
    tpu.vector_store %arg4[%c2_24, %c0_25, %c0_26], %74 {strides = array<i32>} : memref<8x8x32xf32, #tpu.memory_space<vmem>>, vector<1x8x32xf32>,
    %c3 = arith.constant 3 : index
    %c0_27 = arith.constant 0 : index
    %c0_28 = arith.constant 0 : index
    %75 = vector.load %arg2[%c3, %c0_27, %c0_28] : memref<8x8x128xf32, #tpu.memory_space<vmem>>, vector<1x8x128xf32>
    %76 = vector.shape_cast %75 : vector<1x8x128xf32> to vector<8x128xf32>
    %cst_29 = arith.constant dense<0.000000e+00> : vector<8x128xf32>
    %77 = tpu.matmul %71, %3, %cst_29 {dimension_numbers = #tpu.dot_dimension_numbers<[1], [0], [0], [1], [0, 0, 1, 1], [], []>} : vector<8x32xf32>, vector<32x128xf32>, vector<8x128xf32> -> vector<8x128xf32>
    %78 = arith.addf %76, %77 : vector<8x128xf32>
    %79 = vector.extract_strided_slice %78 {offsets = [0, 0], sizes = [8, 96], strides = [1, 1]} : vector<8x128xf32> to vector<8x96xf32>
    %80 = arith.negf %79 : vector<8x96xf32>
    %81 = math.exp %80 : vector<8x96xf32>
    %cst_30 = arith.constant 1.000000e+00 : f32
    %82 = vector.broadcast %cst_30 : f32 to vector<8x96xf32>
    %83 = arith.addf %82, %81 : vector<8x96xf32>
    %84 = arith.divf %82, %83 : vector<8x96xf32>
    %85 = vector.extract_strided_slice %84 {offsets = [0, 0], sizes = [8, 32], strides = [1, 1]} : vector<8x96xf32> to vector<8x32xf32>
    %86 = vector.extract_strided_slice %84 {offsets = [0, 32], sizes = [8, 32], strides = [1, 1]} : vector<8x96xf32> to vector<8x32xf32>
    %87 = vector.extract_strided_slice %84 {offsets = [0, 64], sizes = [8, 32], strides = [1, 1]} : vector<8x96xf32> to vector<8x32xf32>
    %88 = vector.extract_strided_slice %78 {offsets = [0, 96], sizes = [8, 32], strides = [1, 1]} : vector<8x128xf32> to vector<8x32xf32>
    %89 = math.tanh %88 : vector<8x32xf32>
    %90 = arith.mulf %86, %69 : vector<8x32xf32>
    %91 = arith.mulf %85, %89 : vector<8x32xf32>
    %92 = arith.addf %90, %91 : vector<8x32xf32>
    %93 = math.tanh %92 : vector<8x32xf32>
    %94 = arith.mulf %87, %93 : vector<8x32xf32>
    %c3_31 = arith.constant 3 : index
    %c0_32 = arith.constant 0 : index
    %c0_33 = arith.constant 0 : index
    %95 = vector.load %arg4[%c3_31, %c0_32, %c0_33] : memref<8x8x32xf32, #tpu.memory_space<vmem>>, vector<1x8x32xf32>
    %96 = vector.shape_cast %95 : vector<1x8x32xf32> to vector<8x32xf32>
    %97 = vector.shape_cast %94 : vector<8x32xf32> to vector<1x8x32xf32>
    tpu.vector_store %arg4[%c3_31, %c0_32, %c0_33], %97 {strides = array<i32>} : memref<8x8x32xf32, #tpu.memory_space<vmem>>, vector<1x8x32xf32>,
    %c4 = arith.constant 4 : index
    %c0_34 = arith.constant 0 : index
    %c0_35 = arith.constant 0 : index
    %98 = vector.load %arg2[%c4, %c0_34, %c0_35] : memref<8x8x128xf32, #tpu.memory_space<vmem>>, vector<1x8x128xf32>
    %99 = vector.shape_cast %98 : vector<1x8x128xf32> to vector<8x128xf32>
    %cst_36 = arith.constant dense<0.000000e+00> : vector<8x128xf32>
    %100 = tpu.matmul %94, %3, %cst_36 {dimension_numbers = #tpu.dot_dimension_numbers<[1], [0], [0], [1], [0, 0, 1, 1], [], []>} : vector<8x32xf32>, vector<32x128xf32>, vector<8x128xf32> -> vector<8x128xf32>
    %101 = arith.addf %99, %100 : vector<8x128xf32>
    %102 = vector.extract_strided_slice %101 {offsets = [0, 0], sizes = [8, 96], strides = [1, 1]} : vector<8x128xf32> to vector<8x96xf32>
    %103 = arith.negf %102 : vector<8x96xf32>
    %104 = math.exp %103 : vector<8x96xf32>
    %cst_37 = arith.constant 1.000000e+00 : f32
    %105 = vector.broadcast %cst_37 : f32 to vector<8x96xf32>
    %106 = arith.addf %105, %104 : vector<8x96xf32>
    %107 = arith.divf %105, %106 : vector<8x96xf32>
    %108 = vector.extract_strided_slice %107 {offsets = [0, 0], sizes = [8, 32], strides = [1, 1]} : vector<8x96xf32> to vector<8x32xf32>
    %109 = vector.extract_strided_slice %107 {offsets = [0, 32], sizes = [8, 32], strides = [1, 1]} : vector<8x96xf32> to vector<8x32xf32>
    %110 = vector.extract_strided_slice %107 {offsets = [0, 64], sizes = [8, 32], strides = [1, 1]} : vector<8x96xf32> to vector<8x32xf32>
    %111 = vector.extract_strided_slice %101 {offsets = [0, 96], sizes = [8, 32], strides = [1, 1]} : vector<8x128xf32> to vector<8x32xf32>
    %112 = math.tanh %111 : vector<8x32xf32>
    %113 = arith.mulf %109, %92 : vector<8x32xf32>
    %114 = arith.mulf %108, %112 : vector<8x32xf32>
    %115 = arith.addf %113, %114 : vector<8x32xf32>
    %116 = math.tanh %115 : vector<8x32xf32>
    %117 = arith.mulf %110, %116 : vector<8x32xf32>
    %c4_38 = arith.constant 4 : index
    %c0_39 = arith.constant 0 : index
    %c0_40 = arith.constant 0 : index
    %118 = vector.load %arg4[%c4_38, %c0_39, %c0_40] : memref<8x8x32xf32, #tpu.memory_space<vmem>>, vector<1x8x32xf32>
    %119 = vector.shape_cast %118 : vector<1x8x32xf32> to vector<8x32xf32>
    %120 = vector.shape_cast %117 : vector<8x32xf32> to vector<1x8x32xf32>
    tpu.vector_store %arg4[%c4_38, %c0_39, %c0_40], %120 {strides = array<i32>} : memref<8x8x32xf32, #tpu.memory_space<vmem>>, vector<1x8x32xf32>,
    %c5 = arith.constant 5 : index
    %c0_41 = arith.constant 0 : index
    %c0_42 = arith.constant 0 : index
    %121 = vector.load %arg2[%c5, %c0_41, %c0_42] : memref<8x8x128xf32, #tpu.memory_space<vmem>>, vector<1x8x128xf32>
    %122 = vector.shape_cast %121 : vector<1x8x128xf32> to vector<8x128xf32>
    %cst_43 = arith.constant dense<0.000000e+00> : vector<8x128xf32>
    %123 = tpu.matmul %117, %3, %cst_43 {dimension_numbers = #tpu.dot_dimension_numbers<[1], [0], [0], [1], [0, 0, 1, 1], [], []>} : vector<8x32xf32>, vector<32x128xf32>, vector<8x128xf32> -> vector<8x128xf32>
    %124 = arith.addf %122, %123 : vector<8x128xf32>
    %125 = vector.extract_strided_slice %124 {offsets = [0, 0], sizes = [8, 96], strides = [1, 1]} : vector<8x128xf32> to vector<8x96xf32>
    %126 = arith.negf %125 : vector<8x96xf32>
    %127 = math.exp %126 : vector<8x96xf32>
    %cst_44 = arith.constant 1.000000e+00 : f32
    %128 = vector.broadcast %cst_44 : f32 to vector<8x96xf32>
    %129 = arith.addf %128, %127 : vector<8x96xf32>
    %130 = arith.divf %128, %129 : vector<8x96xf32>
    %131 = vector.extract_strided_slice %130 {offsets = [0, 0], sizes = [8, 32], strides = [1, 1]} : vector<8x96xf32> to vector<8x32xf32>
    %132 = vector.extract_strided_slice %130 {offsets = [0, 32], sizes = [8, 32], strides = [1, 1]} : vector<8x96xf32> to vector<8x32xf32>
    %133 = vector.extract_strided_slice %130 {offsets = [0, 64], sizes = [8, 32], strides = [1, 1]} : vector<8x96xf32> to vector<8x32xf32>
    %134 = vector.extract_strided_slice %124 {offsets = [0, 96], sizes = [8, 32], strides = [1, 1]} : vector<8x128xf32> to vector<8x32xf32>
    %135 = math.tanh %134 : vector<8x32xf32>
    %136 = arith.mulf %132, %115 : vector<8x32xf32>
    %137 = arith.mulf %131, %135 : vector<8x32xf32>
    %138 = arith.addf %136, %137 : vector<8x32xf32>
    %139 = math.tanh %138 : vector<8x32xf32>
    %140 = arith.mulf %133, %139 : vector<8x32xf32>
    %c5_45 = arith.constant 5 : index
    %c0_46 = arith.constant 0 : index
    %c0_47 = arith.constant 0 : index
    %141 = vector.load %arg4[%c5_45, %c0_46, %c0_47] : memref<8x8x32xf32, #tpu.memory_space<vmem>>, vector<1x8x32xf32>
    %142 = vector.shape_cast %141 : vector<1x8x32xf32> to vector<8x32xf32>
    %143 = vector.shape_cast %140 : vector<8x32xf32> to vector<1x8x32xf32>
    tpu.vector_store %arg4[%c5_45, %c0_46, %c0_47], %143 {strides = array<i32>} : memref<8x8x32xf32, #tpu.memory_space<vmem>>, vector<1x8x32xf32>,
    %c6 = arith.constant 6 : index
    %c0_48 = arith.constant 0 : index
    %c0_49 = arith.constant 0 : index
    %144 = vector.load %arg2[%c6, %c0_48, %c0_49] : memref<8x8x128xf32, #tpu.memory_space<vmem>>, vector<1x8x128xf32>
    %145 = vector.shape_cast %144 : vector<1x8x128xf32> to vector<8x128xf32>
    %cst_50 = arith.constant dense<0.000000e+00> : vector<8x128xf32>
    %146 = tpu.matmul %140, %3, %cst_50 {dimension_numbers = #tpu.dot_dimension_numbers<[1], [0], [0], [1], [0, 0, 1, 1], [], []>} : vector<8x32xf32>, vector<32x128xf32>, vector<8x128xf32> -> vector<8x128xf32>
    %147 = arith.addf %145, %146 : vector<8x128xf32>
    %148 = vector.extract_strided_slice %147 {offsets = [0, 0], sizes = [8, 96], strides = [1, 1]} : vector<8x128xf32> to vector<8x96xf32>
    %149 = arith.negf %148 : vector<8x96xf32>
    %150 = math.exp %149 : vector<8x96xf32>
    %cst_51 = arith.constant 1.000000e+00 : f32
    %151 = vector.broadcast %cst_51 : f32 to vector<8x96xf32>
    %152 = arith.addf %151, %150 : vector<8x96xf32>
    %153 = arith.divf %151, %152 : vector<8x96xf32>
    %154 = vector.extract_strided_slice %153 {offsets = [0, 0], sizes = [8, 32], strides = [1, 1]} : vector<8x96xf32> to vector<8x32xf32>
    %155 = vector.extract_strided_slice %153 {offsets = [0, 32], sizes = [8, 32], strides = [1, 1]} : vector<8x96xf32> to vector<8x32xf32>
    %156 = vector.extract_strided_slice %153 {offsets = [0, 64], sizes = [8, 32], strides = [1, 1]} : vector<8x96xf32> to vector<8x32xf32>
    %157 = vector.extract_strided_slice %147 {offsets = [0, 96], sizes = [8, 32], strides = [1, 1]} : vector<8x128xf32> to vector<8x32xf32>
    %158 = math.tanh %157 : vector<8x32xf32>
    %159 = arith.mulf %155, %138 : vector<8x32xf32>
    %160 = arith.mulf %154, %158 : vector<8x32xf32>
    %161 = arith.addf %159, %160 : vector<8x32xf32>
    %162 = math.tanh %161 : vector<8x32xf32>
    %163 = arith.mulf %156, %162 : vector<8x32xf32>
    %c6_52 = arith.constant 6 : index
    %c0_53 = arith.constant 0 : index
    %c0_54 = arith.constant 0 : index
    %164 = vector.load %arg4[%c6_52, %c0_53, %c0_54] : memref<8x8x32xf32, #tpu.memory_space<vmem>>, vector<1x8x32xf32>
    %165 = vector.shape_cast %164 : vector<1x8x32xf32> to vector<8x32xf32>
    %166 = vector.shape_cast %163 : vector<8x32xf32> to vector<1x8x32xf32>
    tpu.vector_store %arg4[%c6_52, %c0_53, %c0_54], %166 {strides = array<i32>} : memref<8x8x32xf32, #tpu.memory_space<vmem>>, vector<1x8x32xf32>,
    %c7 = arith.constant 7 : index
    %c0_55 = arith.constant 0 : index
    %c0_56 = arith.constant 0 : index
    %167 = vector.load %arg2[%c7, %c0_55, %c0_56] : memref<8x8x128xf32, #tpu.memory_space<vmem>>, vector<1x8x128xf32>
    %168 = vector.shape_cast %167 : vector<1x8x128xf32> to vector<8x128xf32>
    %cst_57 = arith.constant dense<0.000000e+00> : vector<8x128xf32>
    %169 = tpu.matmul %163, %3, %cst_57 {dimension_numbers = #tpu.dot_dimension_numbers<[1], [0], [0], [1], [0, 0, 1, 1], [], []>} : vector<8x32xf32>, vector<32x128xf32>, vector<8x128xf32> -> vector<8x128xf32>
    %170 = arith.addf %168, %169 : vector<8x128xf32>
    %171 = vector.extract_strided_slice %170 {offsets = [0, 0], sizes = [8, 96], strides = [1, 1]} : vector<8x128xf32> to vector<8x96xf32>
    %172 = arith.negf %171 : vector<8x96xf32>
    %173 = math.exp %172 : vector<8x96xf32>
    %cst_58 = arith.constant 1.000000e+00 : f32
    %174 = vector.broadcast %cst_58 : f32 to vector<8x96xf32>
    %175 = arith.addf %174, %173 : vector<8x96xf32>
    %176 = arith.divf %174, %175 : vector<8x96xf32>
    %177 = vector.extract_strided_slice %176 {offsets = [0, 0], sizes = [8, 32], strides = [1, 1]} : vector<8x96xf32> to vector<8x32xf32>
    %178 = vector.extract_strided_slice %176 {offsets = [0, 32], sizes = [8, 32], strides = [1, 1]} : vector<8x96xf32> to vector<8x32xf32>
    %179 = vector.extract_strided_slice %176 {offsets = [0, 64], sizes = [8, 32], strides = [1, 1]} : vector<8x96xf32> to vector<8x32xf32>
    %180 = vector.extract_strided_slice %170 {offsets = [0, 96], sizes = [8, 32], strides = [1, 1]} : vector<8x128xf32> to vector<8x32xf32>
    %181 = math.tanh %180 : vector<8x32xf32>
    %182 = arith.mulf %178, %161 : vector<8x32xf32>
    %183 = arith.mulf %177, %181 : vector<8x32xf32>
    %184 = arith.addf %182, %183 : vector<8x32xf32>
    %185 = math.tanh %184 : vector<8x32xf32>
    %186 = arith.mulf %179, %185 : vector<8x32xf32>
    %c7_59 = arith.constant 7 : index
    %c0_60 = arith.constant 0 : index
    %c0_61 = arith.constant 0 : index
    %187 = vector.load %arg4[%c7_59, %c0_60, %c0_61] : memref<8x8x32xf32, #tpu.memory_space<vmem>>, vector<1x8x32xf32>
    %188 = vector.shape_cast %187 : vector<1x8x32xf32> to vector<8x32xf32>
    %189 = vector.shape_cast %186 : vector<8x32xf32> to vector<1x8x32xf32>
    tpu.vector_store %arg4[%c7_59, %c0_60, %c0_61], %189 {strides = array<i32>} : memref<8x8x32xf32, #tpu.memory_space<vmem>>, vector<1x8x32xf32>,
    %c0_62 = arith.constant 0 : index
    %c0_63 = arith.constant 0 : index
    %190 = vector.load %arg6[%c0_62, %c0_63] : memref<8x32xf32, #tpu.memory_space<vmem>>, vector<8x32xf32>
    tpu.vector_store %arg6[%c0_62, %c0_63], %186 {strides = array<i32>} : memref<8x32xf32, #tpu.memory_space<vmem>>, vector<8x32xf32>,
    %c0_64 = arith.constant 0 : index
    %c0_65 = arith.constant 0 : index
    %191 = vector.load %arg7[%c0_64, %c0_65] : memref<8x32xf32, #tpu.memory_space<vmem>>, vector<8x32xf32>
    tpu.vector_store %arg7[%c0_64, %c0_65], %184 {strides = array<i32>} : memref<8x32xf32, #tpu.memory_space<vmem>>, vector<8x32xf32>,
    %c0_i32_66 = arith.constant 0 : i32
    %192 = arith.cmpi eq, %arg1, %c0_i32_66 : i32
    %193 = arith.extui %192 : i1 to i32
    %c0_i32_67 = arith.constant 0 : i32
    %194 = arith.cmpi ne, %193, %c0_i32_67 : i32
    scf.if %194 {
      %c0_68 = arith.constant 0 : index
      %c0_69 = arith.constant 0 : index
      %195 = vector.load %arg5[%c0_68, %c0_69] : memref<8x32xf32, #tpu.memory_space<vmem>>, vector<8x32xf32>
      tpu.vector_store %arg5[%c0_68, %c0_69], %184 {strides = array<i32>} : memref<8x32xf32, #tpu.memory_space<vmem>>, vector<8x32xf32>,
    } else {
    }
    return
  }
  func.func @transform_0(%arg0: i32, %arg1: i32) -> (i32, i32, i32) {
    %c0_i32 = arith.constant 0 : i32
    %c0_i32_0 = arith.constant 0 : i32
    return %arg1, %arg0, %c0_i32 : i32, i32, i32
  }
  func.func @transform_1(%arg0: i32, %arg1: i32) -> (i32, i32) {
    %c0_i32 = arith.constant 0 : i32
    %c0_i32_0 = arith.constant 0 : i32
    %c0_i32_1 = arith.constant 0 : i32
    return %c0_i32, %c0_i32_0 : i32, i32
  }
  func.func @transform_2(%arg0: i32, %arg1: i32) -> (i32, i32, i32) {
    %c0_i32 = arith.constant 0 : i32
    %c0_i32_0 = arith.constant 0 : i32
    return %arg1, %arg0, %c0_i32 : i32, i32, i32
  }
  func.func @transform_3(%arg0: i32, %arg1: i32) -> (i32, i32) {
    %c0_i32 = arith.constant 0 : i32
    %c0_i32_0 = arith.constant 0 : i32
    return %arg0, %c0_i32 : i32, i32
  }
}

</mosaic_0001>

<bundles_post_ra>
// kernel: tpu_custom_call.1
= control target key start
LH: loop header
LB: loop body
LE: loop exit
PB: predicated region body
PF: predicated region fallthrough
CT: control target
= control target key end

     0   :  { %9 = vsyncpa [#allocation5], 0  ;;  %s1503_s0 = inlined_call_operand.hbm [shape: f32[8,8,128], index: 0, kind: input, shape index: {}]   ;;  %s1504_s1 = inlined_call_operand.hbm [shape: f32[32,128], index: 1, kind: input, shape index: {}]   ;;  %s1505_s2 = inlined_call_operand.hbm [shape: f32[8,8,32], index: 2, kind: output, shape index: {0}]   ;;  %s1506_s3 = inlined_call_operand.hbm [shape: f32[8,32], index: 3, kind: output, shape index: {1}]  }
   0x1   :  { %10 = vsyncpa [#allocation8], 0 }
   0x2   :  { %11 = vsyncpa [#allocation6], 0 }
   0x3   :  { %12 = vsyncpa [#allocation11], 0  ;;  %s1306_s12 = smov [#allocation4]   ;;  %s1210_s16 = scalar_lea.hbm %s1503_s0, 1024 }
   0x4   :  { %s18_s13 = sshll.u32 %s1306_s12, 4  ;;  %p1211_p0 = scmp.ne.s32.totalorder %s1503_s0, %s1210_s16  ;;  %s19_s13 = int_to_ptr.vmem [resolvable:$true] %s18_s13 }
   0x5   :  { %p1214_p1 = scmp.lt.u32.totalorder %s1210_s16, %s1503_s0 }
   0x7   :  { %p1216_p2 = pnand %p1214_p1, %p1211_p0 }
   0x9   :  { %1219 = shalt.err (!%p1216_p2)
}
   0xa   :  { %s1220_s21 = scalar_lea.vmem %s19_s13, 1024  ;;  %p1225_p4 = scmp.lt.s32.totalorder %s19_s13, %s19_s13 }
   0xb   :  { %p1221_p3 = scmp.ne.s32.totalorder %s19_s13, %s1220_s21  ;;  %p1226_p5 = scmp.lt.s32.totalorder %s1220_s21, %s1220_s21 }
   0xd   :  { %p1227_p6 = por %p1226_p5, %p1225_p4 }
   0xf   :  { %p1228_p7 = pnand %p1227_p6, %p1221_p3 }
  0x11   :  { %1231 = shalt.err (!%p1228_p7)
}
  0x12   :  { %s1307_s22 = smov 128   ;;  %s1308_s23 = smov 8  }
  0x13   :  { %24 = dma.hbm_to_vmem [thread:$0]  %s1503_s0, 1024, %s19_s13, [#allocation5], %s1307_s22, %s1307_s22, %s1308_s23  }
  0x14   :  { %s1309_s26 = smov [#allocation7]   ;;  %s1232_s30 = scalar_lea.hbm %s1504_s1, 512 }
  0x15   :  { %s30_s27 = sshll.u32 %s1309_s26, 4  ;;  %p1233_p8 = scmp.ne.s32.totalorder %s1504_s1, %s1232_s30  ;;  %s31_s27 = int_to_ptr.vmem [resolvable:$true] %s30_s27 }
  0x16   :  { %p1236_p9 = scmp.lt.u32.totalorder %s1232_s30, %s1504_s1 }
  0x18   :  { %p1238_p10 = pnand %p1236_p9, %p1233_p8 }
  0x1a   :  { %1241 = shalt.err (!%p1238_p10)
}
  0x1b   :  { %s1242_s8 = scalar_lea.vmem %s31_s27, 512  ;;  %p1247_p12 = scmp.lt.s32.totalorder %s31_s27, %s31_s27 }
  0x1c   :  { %p1243_p11 = scmp.ne.s32.totalorder %s31_s27, %s1242_s8  ;;  %p1248_p13 = scmp.lt.s32.totalorder %s1242_s8, %s1242_s8 }
  0x1e   :  { %p1249_p0 = por %p1248_p13, %p1247_p12 }
  0x20   :  { %p1250_p1 = pnand %p1249_p0, %p1243_p11 }
  0x22   :  { %1253 = shalt.err (!%p1250_p1)
}
  0x23   :  { %36 = dma.hbm_to_vmem [thread:$0]  %s1504_s1, 512, %s31_s27, [#allocation8], %s1307_s22, %s1307_s22, %s1308_s23  }
  0x24   :  { %1298 = dma.done.wait [#allocation5], 1024  }
  0x25   :  { %1299 = vsyncadd [#allocation5], 4294966272 }
  0x26   :  { %1300 = dma.done.wait [#allocation8], 512  }
  0x27   :  { %1301 = vsyncadd [#allocation8], 4294966784  ;;  %vm47_vm0 = vcmask 261120   ;;  %v1310_v0 = vmov 0.0|0.0   ;;  %vm1311_vm1 = vmmov 0   ;;  %v1312_v1 = vmov 0.0  }
  0x28   :  { %1086 = vmatprep.subr.bf16.mxu0 %v1310_v0  ;;  %1006 = vmatprep.mubr.msk.f32.mxu0 %vm1311_vm1, %v1312_v1  ;;  %48 = vst.msk [vmem:[#allocation2] sm:$0xff] %vm47_vm0, %v1312_v1  ;;  %49 = vst.msk [vmem:[#allocation3] sm:$0xff] %vm47_vm0, %v1312_v1  ;;  %v50_v2 = vld [vmem:[#allocation7] sm:$0xff]  ;;  %v51_v3 = vld [vmem:[#allocation7 + $0x8] sm:$0xff]  ;;  %s1313_s1 = smov 32   ;;  %s1314_s10 = smov 64  }
  0x29   :  { %1092 = vmatprep.subr.bf16.mxu1 %v1310_v0  ;;  %1017 = vmatprep.mubr.msk.f32.mxu1 %vm1311_vm1, %v1312_v1  ;;  %v52_v4 = vld [vmem:[#allocation7 + $0x10] sm:$0xff]  ;;  %v1378_v5 = vpack.c.bf16 %v51_v3, %v50_v2  ;;  %v53_v6 = vld [vmem:[#allocation7 + $0x18] sm:$0xff]  ;;  %v56_v9 = vld [vmem:[#allocation4] sm:$0xff]  ;;  %s1315_s11 = smov 96   ;;  %s1316_s12 = smov [#allocation10]  }
  0x2a   :  { %v1381_v7 = vpack.c.bf16 %v53_v6, %v52_v4  ;;  %v166_v29 = vld [vmem:[#allocation4 + $0x8] sm:$0xff]  ;;  %v271_v47 = vld [vmem:[#allocation4 + $0x10] sm:$0xff]  ;;  %v376_v3 = vld [vmem:[#allocation4 + $0x18] sm:$0xff]  ;;  %s928_s13 = sshll.u32 %s1316_s12, 4  ;;  %s929_s13 = int_to_ptr.vmem [resolvable:$true] %s928_s13 }
  0x2b   :  { %1088 = vmatpush3.bf16.msra.mxu0 %v1378_v5  ;;  %1094 = vmatpush3.bf16.msra.mxu1 %v1378_v5  ;;  %s1254_s14 = scalar_lea.vmem %s929_s13, 128  ;;  %p1259_p3 = scmp.lt.s32.totalorder %s929_s13, %s929_s13 }
  0x2c   :  { %1089 = vmatprep.subr.bf16.mxu0 %v1310_v0  ;;  %1095 = vmatprep.subr.bf16.mxu1 %v1310_v0  ;;  %p1255_p2 = scmp.ne.s32.totalorder %s929_s13, %s1254_s14  ;;  %p1260_p4 = scmp.lt.s32.totalorder %s1254_s14, %s1254_s14 }
  0x2e   :  { %p1261_p5 = por %p1260_p4, %p1259_p3 }
  0x2f   :  { %1091 = vmatpush3.bf16.msra.mxu0 %v1381_v7  ;;  %v54_v8 = vld [vmem:[#allocation2] sm:$0xff]  ;;  %1097 = vmatpush3.bf16.msra.mxu1 %v1381_v7  ;;  %v55_v14 = vld [vmem:[#allocation3] sm:$0xff] }
  0x30   :  { %1098 = vmatprep.subr.bf16.mxu0 %v1310_v0  ;;  %1104 = vmatprep.subr.bf16.mxu1 %v1310_v0  ;;  %p1262_p6 = pnand %p1261_p5, %p1255_p2 }
  0x32   :  { %1007 = vmatmul.mubr.msk.f32.vlgmr.msra.gmra.mrb[0].mxu0 %vm47_vm0, %v54_v8 }
  0x33   :  { %1100 = vmatpush3.bf16.msra.mxu0 %v1378_v5  ;;  %1028 = vmatprep.mubr.msk.f32.mxu0 %vm1311_vm1, %v1312_v1 }
  0x34   :  { %1101 = vmatprep.subr.bf16.mxu0 %v1310_v0 }
  0x37   :  { %1103 = vmatpush3.bf16.msra.mxu0 %v1381_v7 }
  0x38   :  { %1110 = vmatprep.subr.bf16.mxu0 %v1310_v0 }
 0x105   :  { %v127_v10 = vpop.f32.mrb[0].mxu0 }
 0x106   :  { %v131_v11 = vadd.f32 %v127_v10, %v56_v9  ;;  %v1008_v12 = vpop.f32.mrb[1].mxu0 }
 0x108   :  { %1146 = vtanh.f32 %v131_v11  ;;  %v943_v15 = vmul.f32 -1.442695, %v131_v11 }
 0x10a   :  { %1148 = vpow2.f32 %v943_v15 }
 0x112   :  { %v1147_v13 = vpop.eup %1146 }
 0x113   :  { %145 = vrot.lane.b32.xlu0 %v1147_v13, %s1313_s1 }
 0x114   :  { %v1149_v16 = vpop.eup %1148 }
 0x115   :  { %v135_v17 = vadd.f32 1.0, %v1149_v16 }
 0x117   :  { %140 = vrot.lane.b32.xlu0 %v55_v14, %s1313_s1  ;;  %1150 = vrcp.f32 %v135_v17 }
 0x121   :  { %v1151_v18 = vpop.eup %1150 }
 0x185   :  { %v146_v19 = vpop.permute.xlu0 %145 }
 0x186   :  { %v148_v20 = vmul.f32 %v1151_v18, %v146_v19 }
 0x188   :  { %150 = vrot.lane.b32.xlu1 %v148_v20, %s1313_s1 }
 0x189   :  { %v141_v21 = vpop.permute.xlu0 %140 }
 0x18a   :  { %v143_v22 = vmul.f32 %v1151_v18, %v141_v21 }
 0x1fa   :  { %v151_v23 = vpop.permute.xlu1 %150 }
 0x1fb   :  { %v153_v24 = vadd.f32 %v151_v23, %v143_v22  ;;  %v481_v23 = vld [vmem:[#allocation4 + $0x20] sm:$0xff] }
 0x1fd   :  { %1152 = vtanh.f32 %v153_v24 }
 0x207   :  { %v1153_v25 = vpop.eup %1152 }
 0x208   :  { %156 = vrot.lane.b32.xlu1 %v1153_v25, %s1313_s1 }
 0x27a   :  { %v157_v26 = vpop.permute.xlu1 %156 }
 0x27b   :  { %v159_v27 = vmul.f32 %v1151_v18, %v157_v26 }
 0x27d   :  { %161 = vrot.lane.b32.xlu0 %v159_v27, %s1314_s10 }
 0x2ef   :  { %v162_v28 = vpop.permute.xlu0 %161 }
 0x2f0   :  { %164 = vst.msk [vmem:[#allocation9] sm:$0xff] %vm47_vm0, %v162_v28  ;;  %1018 = vmatmul.mubr.msk.f32.vlgmr.msra.gmra.mrb[0].mxu1 %vm47_vm0, %v162_v28 }
 0x2f1   :  { %1106 = vmatpush3.bf16.msra.mxu1 %v1378_v5  ;;  %1039 = vmatprep.mubr.msk.f32.mxu1 %vm1311_vm1, %v1312_v1 }
 0x2f2   :  { %1107 = vmatprep.subr.bf16.mxu1 %v1310_v0 }
 0x2f5   :  { %1109 = vmatpush3.bf16.msra.mxu1 %v1381_v7 }
 0x2f6   :  { %1116 = vmatprep.subr.bf16.mxu1 %v1310_v0 }
 0x3c3   :  { %v235_v30 = vpop.f32.mrb[0].mxu1 }
 0x3c4   :  { %v239_v31 = vadd.f32 %v235_v30, %v166_v29  ;;  %v1019_v32 = vpop.f32.mrb[1].mxu1 }
 0x3c6   :  { %1154 = vtanh.f32 %v239_v31  ;;  %v945_v34 = vmul.f32 -1.442695, %v239_v31 }
 0x3c8   :  { %1156 = vpow2.f32 %v945_v34 }
 0x3d0   :  { %v1155_v33 = vpop.eup %1154 }
 0x3d1   :  { %249 = vrot.lane.b32.xlu1 %v1155_v33, %s1313_s1 }
 0x3d2   :  { %v1157_v35 = vpop.eup %1156 }
 0x3d3   :  { %v243_v36 = vadd.f32 1.0, %v1157_v35 }
 0x3d5   :  { %1158 = vrcp.f32 %v243_v36 }
 0x3df   :  { %v1159_v37 = vpop.eup %1158 }
 0x3e0   :  { %v247_v40 = vmul.f32 %v1159_v37, %v153_v24 }
 0x443   :  { %v250_v38 = vpop.permute.xlu1 %249 }
 0x444   :  { %v252_v39 = vmul.f32 %v1159_v37, %v250_v38 }
 0x446   :  { %254 = vrot.lane.b32.xlu0 %v252_v39, %s1313_s1 }
 0x4b8   :  { %v255_v41 = vpop.permute.xlu0 %254 }
 0x4b9   :  { %v257_v42 = vadd.f32 %v255_v41, %v247_v40  ;;  %v586_v41 = vld [vmem:[#allocation4 + $0x28] sm:$0xff] }
 0x4bb   :  { %1160 = vtanh.f32 %v257_v42 }
 0x4c5   :  { %v1161_v43 = vpop.eup %1160 }
 0x4c6   :  { %260 = vrot.lane.b32.xlu1 %v1161_v43, %s1313_s1 }
 0x538   :  { %v261_v44 = vpop.permute.xlu1 %260 }
 0x539   :  { %v263_v45 = vmul.f32 %v1159_v37, %v261_v44 }
 0x53b   :  { %265 = vrot.lane.b32.xlu0 %v263_v45, %s1314_s10 }
 0x5ad   :  { %v266_v46 = vpop.permute.xlu0 %265 }
 0x5ae   :  { %269 = vst.msk [vmem:[#allocation9 + $0x8] sm:$0xff] %vm47_vm0, %v266_v46  ;;  %1029 = vmatmul.mubr.msk.f32.vlgmr.msra.gmra.mrb[2].mxu0 %vm47_vm0, %v266_v46 }
 0x5af   :  { %1112 = vmatpush3.bf16.msra.mxu0 %v1378_v5  ;;  %1050 = vmatprep.mubr.msk.f32.mxu0 %vm1311_vm1, %v1312_v1 }
 0x5b0   :  { %1113 = vmatprep.subr.bf16.mxu0 %v1310_v0 }
 0x5b3   :  { %1115 = vmatpush3.bf16.msra.mxu0 %v1381_v7 }
 0x5b4   :  { %1122 = vmatprep.subr.bf16.mxu0 %v1310_v0 }
 0x681   :  { %v340_v48 = vpop.f32.mrb[2].mxu0 }
 0x682   :  { %v344_v49 = vadd.f32 %v340_v48, %v271_v47  ;;  %v1030_v50 = vpop.f32.mrb[3].mxu0 }
 0x684   :  { %1162 = vtanh.f32 %v344_v49  ;;  %v947_v52 = vmul.f32 -1.442695, %v344_v49 }
 0x686   :  { %1164 = vpow2.f32 %v947_v52 }
 0x68e   :  { %v1163_v51 = vpop.eup %1162 }
 0x68f   :  { %354 = vrot.lane.b32.xlu1 %v1163_v51, %s1313_s1 }
 0x690   :  { %v1165_v53 = vpop.eup %1164 }
 0x691   :  { %v348_v54 = vadd.f32 1.0, %v1165_v53 }
 0x693   :  { %1166 = vrcp.f32 %v348_v54 }
 0x69d   :  { %v1167_v55 = vpop.eup %1166 }
 0x69e   :  { %v352_v58 = vmul.f32 %v1167_v55, %v257_v42 }
 0x701   :  { %v355_v56 = vpop.permute.xlu1 %354 }
 0x702   :  { %v357_v57 = vmul.f32 %v1167_v55, %v355_v56 }
 0x704   :  { %359 = vrot.lane.b32.xlu0 %v357_v57, %s1313_s1 }
 0x776   :  { %v360_v59 = vpop.permute.xlu0 %359 }
 0x777   :  { %v362_v60 = vadd.f32 %v360_v59, %v352_v58 }
 0x779   :  { %1168 = vtanh.f32 %v362_v60 }
 0x783   :  { %v1169_v61 = vpop.eup %1168 }
 0x784   :  { %365 = vrot.lane.b32.xlu1 %v1169_v61, %s1313_s1 }
 0x7f6   :  { %v366_v62 = vpop.permute.xlu1 %365 }
 0x7f7   :  { %v368_v63 = vmul.f32 %v1167_v55, %v366_v62  ;;  %v691_v55 = vld [vmem:[#allocation4 + $0x30] sm:$0xff] }
 0x7f9   :  { %370 = vrot.lane.b32.xlu0 %v368_v63, %s1314_s10 }
 0x86b   :  { %v371_v2 = vpop.permute.xlu0 %370 }
 0x86c   :  { %374 = vst.msk [vmem:[#allocation9 + $0x10] sm:$0xff] %vm47_vm0, %v371_v2  ;;  %1040 = vmatmul.mubr.msk.f32.vlgmr.msra.gmra.mrb[2].mxu1 %vm47_vm0, %v371_v2 }
 0x86d   :  { %1118 = vmatpush3.bf16.msra.mxu1 %v1378_v5  ;;  %1061 = vmatprep.mubr.msk.f32.mxu1 %vm1311_vm1, %v1312_v1 }
 0x86e   :  { %1119 = vmatprep.subr.bf16.mxu1 %v1310_v0 }
 0x871   :  { %1121 = vmatpush3.bf16.msra.mxu1 %v1381_v7 }
 0x872   :  { %1128 = vmatprep.subr.bf16.mxu1 %v1310_v0 }
 0x93f   :  { %v445_v4 = vpop.f32.mrb[2].mxu1 }
 0x940   :  { %v449_v6 = vadd.f32 %v445_v4, %v376_v3  ;;  %v1041_v8 = vpop.f32.mrb[3].mxu1 }
 0x942   :  { %1170 = vtanh.f32 %v449_v6  ;;  %v949_v10 = vmul.f32 -1.442695, %v449_v6 }
 0x944   :  { %1172 = vpow2.f32 %v949_v10 }
 0x94c   :  { %v1171_v9 = vpop.eup %1170 }
 0x94d   :  { %459 = vrot.lane.b32.xlu1 %v1171_v9, %s1313_s1 }
 0x94e   :  { %v1173_v11 = vpop.eup %1172 }
 0x94f   :  { %v453_v12 = vadd.f32 1.0, %v1173_v11 }
 0x951   :  { %1174 = vrcp.f32 %v453_v12 }
 0x95b   :  { %v1175_v13 = vpop.eup %1174 }
 0x95c   :  { %v457_v16 = vmul.f32 %v1175_v13, %v362_v60 }
 0x9bf   :  { %v460_v14 = vpop.permute.xlu1 %459 }
 0x9c0   :  { %v462_v15 = vmul.f32 %v1175_v13, %v460_v14 }
 0x9c2   :  { %464 = vrot.lane.b32.xlu0 %v462_v15, %s1313_s1 }
 0xa34   :  { %v465_v17 = vpop.permute.xlu0 %464 }
 0xa35   :  { %v467_v18 = vadd.f32 %v465_v17, %v457_v16 }
 0xa37   :  { %1176 = vtanh.f32 %v467_v18 }
 0xa41   :  { %v1177_v19 = vpop.eup %1176 }
 0xa42   :  { %470 = vrot.lane.b32.xlu1 %v1177_v19, %s1313_s1 }
 0xab4   :  { %v471_v20 = vpop.permute.xlu1 %470 }
 0xab5   :  { %v473_v21 = vmul.f32 %v1175_v13, %v471_v20  ;;  %v796_v13 = vld [vmem:[#allocation4 + $0x38] sm:$0xff] }
 0xab7   :  { %475 = vrot.lane.b32.xlu0 %v473_v21, %s1314_s10 }
 0xb29   :  { %v476_v22 = vpop.permute.xlu0 %475 }
 0xb2a   :  { %479 = vst.msk [vmem:[#allocation9 + $0x18] sm:$0xff] %vm47_vm0, %v476_v22  ;;  %1051 = vmatmul.mubr.msk.f32.vlgmr.msra.gmra.mrb[4].mxu0 %vm47_vm0, %v476_v22 }
 0xb2b   :  { %1124 = vmatpush3.bf16.msra.mxu0 %v1378_v5  ;;  %1072 = vmatprep.mubr.msk.f32.mxu0 %vm1311_vm1, %v1312_v1 }
 0xb2c   :  { %1125 = vmatprep.subr.bf16.mxu0 %v1310_v0 }
 0xb2f   :  { %1127 = vmatpush3.bf16.msra.mxu0 %v1381_v7 }
 0xbfd   :  { %v550_v24 = vpop.f32.mrb[4].mxu0 }
 0xbfe   :  { %v554_v25 = vadd.f32 %v550_v24, %v481_v23  ;;  %v1052_v26 = vpop.f32.mrb[5].mxu0 }
 0xc00   :  { %1178 = vtanh.f32 %v554_v25  ;;  %v951_v28 = vmul.f32 -1.442695, %v554_v25 }
 0xc02   :  { %1180 = vpow2.f32 %v951_v28 }
 0xc0a   :  { %v1179_v27 = vpop.eup %1178 }
 0xc0b   :  { %564 = vrot.lane.b32.xlu1 %v1179_v27, %s1313_s1 }
 0xc0c   :  { %v1181_v29 = vpop.eup %1180 }
 0xc0d   :  { %v558_v30 = vadd.f32 1.0, %v1181_v29 }
 0xc0f   :  { %1182 = vrcp.f32 %v558_v30 }
 0xc19   :  { %v1183_v31 = vpop.eup %1182 }
 0xc1a   :  { %v562_v34 = vmul.f32 %v1183_v31, %v467_v18 }
 0xc7d   :  { %v565_v32 = vpop.permute.xlu1 %564 }
 0xc7e   :  { %v567_v33 = vmul.f32 %v1183_v31, %v565_v32 }
 0xc80   :  { %569 = vrot.lane.b32.xlu0 %v567_v33, %s1313_s1 }
 0xcf2   :  { %v570_v35 = vpop.permute.xlu0 %569 }
 0xcf3   :  { %v572_v36 = vadd.f32 %v570_v35, %v562_v34 }
 0xcf5   :  { %1184 = vtanh.f32 %v572_v36 }
 0xcff   :  { %v1185_v37 = vpop.eup %1184 }
 0xd00   :  { %575 = vrot.lane.b32.xlu1 %v1185_v37, %s1313_s1 }
 0xd72   :  { %v576_v38 = vpop.permute.xlu1 %575 }
 0xd73   :  { %v578_v39 = vmul.f32 %v1183_v31, %v576_v38 }
 0xd75   :  { %580 = vrot.lane.b32.xlu0 %v578_v39, %s1314_s10 }
 0xde7   :  { %v581_v40 = vpop.permute.xlu0 %580 }
 0xde8   :  { %584 = vst.msk [vmem:[#allocation9 + $0x20] sm:$0xff] %vm47_vm0, %v581_v40  ;;  %1062 = vmatmul.mubr.msk.f32.vlgmr.msra.gmra.mrb[4].mxu1 %vm47_vm0, %v581_v40 }
 0xde9   :  { %1130 = vmatpush3.bf16.msra.mxu1 %v1378_v5  ;;  %1083 = vmatprep.mubr.msk.f32.mxu1 %vm1311_vm1, %v1312_v1 }
 0xdea   :  { %1131 = vmatprep.subr.bf16.mxu1 %v1310_v0 }
 0xded   :  { %1133 = vmatpush3.bf16.msra.mxu1 %v1381_v7 }
 0xebb   :  { %v655_v42 = vpop.f32.mrb[4].mxu1 }
 0xebc   :  { %v659_v43 = vadd.f32 %v655_v42, %v586_v41  ;;  %v1063_v44 = vpop.f32.mrb[5].mxu1 }
 0xebe   :  { %1186 = vtanh.f32 %v659_v43  ;;  %v953_v46 = vmul.f32 -1.442695, %v659_v43 }
 0xec0   :  { %1188 = vpow2.f32 %v953_v46 }
 0xec8   :  { %v1187_v45 = vpop.eup %1186 }
 0xec9   :  { %669 = vrot.lane.b32.xlu1 %v1187_v45, %s1313_s1 }
 0xeca   :  { %v1189_v47 = vpop.eup %1188 }
 0xecb   :  { %v663_v48 = vadd.f32 1.0, %v1189_v47 }
 0xecd   :  { %1190 = vrcp.f32 %v663_v48 }
 0xed7   :  { %v1191_v5 = vpop.eup %1190 }
 0xed8   :  { %v667_v0 = vmul.f32 %v1191_v5, %v572_v36 }
 0xf3b   :  { %v670_v49 = vpop.permute.xlu1 %669 }
 0xf3c   :  { %v672_v1 = vmul.f32 %v1191_v5, %v670_v49 }
 0xf3e   :  { %674 = vrot.lane.b32.xlu0 %v672_v1, %s1313_s1 }
 0xfb0   :  { %v675_v7 = vpop.permute.xlu0 %674 }
 0xfb1   :  { %v677_v50 = vadd.f32 %v675_v7, %v667_v0 }
 0xfb3   :  { %1192 = vtanh.f32 %v677_v50 }
 0xfbd   :  { %v1193_v51 = vpop.eup %1192 }
 0xfbe   :  { %680 = vrot.lane.b32.xlu1 %v1193_v51, %s1313_s1 }
0x1030   :  { %v681_v52 = vpop.permute.xlu1 %680 }
0x1031   :  { %v683_v53 = vmul.f32 %v1191_v5, %v681_v52 }
0x1033   :  { %685 = vrot.lane.b32.xlu0 %v683_v53, %s1314_s10 }
0x10a5   :  { %v686_v54 = vpop.permute.xlu0 %685 }
0x10a6   :  { %689 = vst.msk [vmem:[#allocation9 + $0x28] sm:$0xff] %vm47_vm0, %v686_v54  ;;  %1073 = vmatmul.mubr.msk.f32.vlgmr.msra.gmra.mrb[6].mxu0 %vm47_vm0, %v686_v54 }
0x1179   :  { %v760_v56 = vpop.f32.mrb[6].mxu0 }
0x117a   :  { %v764_v57 = vadd.f32 %v760_v56, %v691_v55  ;;  %v1074_v58 = vpop.f32.mrb[7].mxu0 }
0x117c   :  { %1194 = vtanh.f32 %v764_v57  ;;  %v955_v60 = vmul.f32 -1.442695, %v764_v57 }
0x117e   :  { %1196 = vpow2.f32 %v955_v60 }
0x1186   :  { %v1195_v59 = vpop.eup %1194 }
0x1187   :  { %774 = vrot.lane.b32.xlu1 %v1195_v59, %s1313_s1 }
0x1188   :  { %v1197_v61 = vpop.eup %1196 }
0x1189   :  { %v768_v62 = vadd.f32 1.0, %v1197_v61 }
0x118b   :  { %1198 = vrcp.f32 %v768_v62 }
0x1195   :  { %v1199_v63 = vpop.eup %1198 }
0x1196   :  { %v772_v4 = vmul.f32 %v1199_v63, %v677_v50 }
0x11f9   :  { %v775_v2 = vpop.permute.xlu1 %774 }
0x11fa   :  { %v777_v3 = vmul.f32 %v1199_v63, %v775_v2 }
0x11fc   :  { %779 = vrot.lane.b32.xlu0 %v777_v3, %s1313_s1 }
0x126e   :  { %v780_v6 = vpop.permute.xlu0 %779 }
0x126f   :  { %v782_v8 = vadd.f32 %v780_v6, %v772_v4 }
0x1271   :  { %1200 = vtanh.f32 %v782_v8 }
0x127b   :  { %v1201_v9 = vpop.eup %1200 }
0x127c   :  { %785 = vrot.lane.b32.xlu1 %v1201_v9, %s1313_s1 }
0x12ee   :  { %v786_v10 = vpop.permute.xlu1 %785 }
0x12ef   :  { %v788_v11 = vmul.f32 %v1199_v63, %v786_v10 }
0x12f1   :  { %790 = vrot.lane.b32.xlu0 %v788_v11, %s1314_s10 }
0x1363   :  { %v791_v12 = vpop.permute.xlu0 %790 }
0x1364   :  { %794 = vst.msk [vmem:[#allocation9 + $0x30] sm:$0xff] %vm47_vm0, %v791_v12  ;;  %1084 = vmatmul.mubr.msk.f32.vlgmr.msra.gmra.mrb[6].mxu1 %vm47_vm0, %v791_v12 }
0x1437   :  { %v865_v14 = vpop.f32.mrb[6].mxu1 }
0x1438   :  { %v869_v15 = vadd.f32 %v865_v14, %v796_v13  ;;  %v1085_v16 = vpop.f32.mrb[7].mxu1 }
0x143a   :  { %1202 = vtanh.f32 %v869_v15  ;;  %v957_v18 = vmul.f32 -1.442695, %v869_v15 }
0x143c   :  { %1204 = vpow2.f32 %v957_v18 }
0x1444   :  { %v1203_v17 = vpop.eup %1202 }
0x1445   :  { %879 = vrot.lane.b32.xlu1 %v1203_v17, %s1313_s1 }
0x1446   :  { %v1205_v19 = vpop.eup %1204 }
0x1447   :  { %v873_v20 = vadd.f32 1.0, %v1205_v19 }
0x1449   :  { %1206 = vrcp.f32 %v873_v20 }
0x1453   :  { %v1207_v21 = vpop.eup %1206 }
0x1454   :  { %v877_v24 = vmul.f32 %v1207_v21, %v782_v8 }
0x14b7   :  { %v880_v22 = vpop.permute.xlu1 %879 }
0x14b8   :  { %v882_v23 = vmul.f32 %v1207_v21, %v880_v22 }
0x14ba   :  { %884 = vrot.lane.b32.xlu0 %v882_v23, %s1313_s1 }
0x152c   :  { %v885_v25 = vpop.permute.xlu0 %884 }
0x152d   :  { %v887_v26 = vadd.f32 %v885_v25, %v877_v24 }
0x152f   :  { %1208 = vtanh.f32 %v887_v26 }
0x1539   :  { %v1209_v27 = vpop.eup %1208 }
0x153a   :  { %890 = vrot.lane.b32.xlu1 %v1209_v27, %s1313_s1 }
0x153e   :  { %902 = vrot.lane.b32.xlu1 %v887_v26, %s1315_s11 }
0x15ac   :  { %v891_v28 = vpop.permute.xlu1 %890 }
0x15ad   :  { %v893_v29 = vmul.f32 %v1207_v21, %v891_v28 }
0x15af   :  { %895 = vrot.lane.b32.xlu0 %v893_v29, %s1314_s10 }
0x15b0   :  { %v903_v30 = vpop.permute.xlu1 %902 }
0x15b1   :  { %905 = vst.msk [vmem:[#allocation3] sm:$0xff] %vm47_vm0, %v903_v30  ;;  %909 = vst.msk [vmem:[#allocation10] sm:$0xff] %vm47_vm0, %v903_v30 }
0x15b2   :  { %1265 = shalt.err (!%p1262_p6)
}
0x15b3   :  { %s1266_s17 = scalar_lea.hbm %s1506_s3, 128 }
0x15b4   :  { %p1267_p7 = scmp.ne.s32.totalorder %s1506_s3, %s1266_s17  ;;  %p1270_p8 = scmp.lt.u32.totalorder %s1266_s17, %s1506_s3 }
0x15b6   :  { %p1272_p9 = pnand %p1270_p8, %p1267_p7 }
0x15b8   :  { %1275 = shalt.err (!%p1272_p9)
}
0x15b9   :  { %931 = dma.vmem_to_hbm [thread:$0]  %s929_s13, 128, %s1506_s3, [#allocation11]  }
0x15ba   :  { %s1317_s26 = smov [#allocation9]  }
0x15bb   :  { %s915_s27 = sshll.u32 %s1317_s26, 4  ;;  %s916_s27 = int_to_ptr.vmem [resolvable:$true] %s915_s27 }
0x15bc   :  { %s1276_s28 = scalar_lea.vmem %s916_s27, 1024  ;;  %p1281_p11 = scmp.lt.s32.totalorder %s916_s27, %s916_s27 }
0x15bd   :  { %p1277_p10 = scmp.ne.s32.totalorder %s916_s27, %s1276_s28  ;;  %p1282_p12 = scmp.lt.s32.totalorder %s1276_s28, %s1276_s28 }
0x15bf   :  { %p1283_p13 = por %p1282_p12, %p1281_p11 }
0x15c1   :  { %p1284_p0 = pnand %p1283_p13, %p1277_p10 }
0x1621   :  { %v896_v31 = vpop.permute.xlu0 %895 }
0x1622   :  { %899 = vst.msk [vmem:[#allocation9 + $0x38] sm:$0xff] %vm47_vm0, %v896_v31  ;;  %900 = vst.msk [vmem:[#allocation2] sm:$0xff] %vm47_vm0, %v896_v31 }
0x1623   :  { %1287 = shalt.err (!%p1284_p0)
}
0x1624   :  { %s1288_s4 = scalar_lea.hbm %s1505_s2, 1024 }
0x1625   :  { %p1289_p1 = scmp.ne.s32.totalorder %s1505_s2, %s1288_s4  ;;  %p1292_p2 = scmp.lt.u32.totalorder %s1288_s4, %s1505_s2 }
0x1627   :  { %p1294_p3 = pnand %p1292_p2, %p1289_p1 }
0x1629   :  { %1297 = shalt.err (!%p1294_p3)
}
0x162a   :  { %921 = dma.vmem_to_hbm [thread:$0]  %s916_s27, 1024, %s1505_s2, [#allocation6], %s1307_s22, %s1307_s22, %s1308_s23  }
0x162b   :  { %1302 = dma.done.wait [#allocation6], 1024  }
0x162c   :  { %1303 = vsyncadd [#allocation6], 4294966272 }
0x162d   :  { %1304 = dma.done.wait [#allocation11], 128  }
0x162e   :  { %1305 = vsyncadd [#allocation11], 4294967168 }
0x162f   :  { %938 = vsyncpa [#allocation5], 1 }
0x1630   :  { %939 = vsyncpa [#allocation8], 1 }
0x1631   :  { %940 = vsyncpa [#allocation6], 1 }
0x1632   :  { %941 = vsyncpa [#allocation11], 1 }

</bundles_post_ra>
